<compile_context>
chip_gen: v7x
topology: tpu7x:2x2x1
jax: 0.10.0
libtpu: 0.0.40
codegen_flags: <defaults>
</compile_context>

<pallas_src>
import functools

import jax
import jax.numpy as jnp
from jax.experimental import pallas as pl
from jax.experimental.pallas import tpu as pltpu

_BN_EPS = 1e-5


def _stats_kernel(x_ref, w_ref, b_ref, sum_ref, sumsq_ref, *, tm, m_actual,
                  mask_tail):
    """Pass 1: accumulate per-channel sum / sum-of-squares of relu(x@w+b)."""
    i = pl.program_id(0)

    @pl.when(i == 0)
    def _():
        sum_ref[...] = jnp.zeros_like(sum_ref)
        sumsq_ref[...] = jnp.zeros_like(sumsq_ref)

    h = jnp.dot(x_ref[...], w_ref[...], preferred_element_type=jnp.float32)
    h = jnp.maximum(h + b_ref[...], 0.0)

    if mask_tail:
        # Zero out rows past the real M so padded rows don't pollute the stats.
        row = i * tm + jax.lax.broadcasted_iota(jnp.int32, h.shape, 0)
        h = jnp.where(row < m_actual, h, 0.0)

    sum_ref[...] += jnp.sum(h, axis=0, keepdims=True)
    sumsq_ref[...] += jnp.sum(h * h, axis=0, keepdims=True)


def _normalize_kernel(x_ref, w_ref, b_ref, scale_ref, shift_ref, o_ref):
    """Pass 2: recompute h = relu(x@w+b) and apply y = h*scale + shift."""
    h = jnp.dot(x_ref[...], w_ref[...], preferred_element_type=jnp.float32)
    h = jnp.maximum(h + b_ref[...], 0.0)
    o_ref[...] = (h * scale_ref[...] + shift_ref[...]).astype(o_ref.dtype)


def protein_cnn_forward(v, w, b, gamma, beta, *, tm_max=512):
    """v: (B, L, hid_dim) -> (B, L, emb_dim).

    w: (hid_dim, emb_dim) linear weight (PyTorch weight transposed),
    b: (emb_dim,) bias, gamma/beta: (emb_dim,) BatchNorm affine params.
    """
    B, L, H = v.shape
    E = w.shape[1]
    M = B * L

    # Row-tile size: cap at tm_max, sublane-align to 8.
    # TODO(synk): E < 128 (toy shapes) still produces masked partial stores;
    # production shapes should keep E a multiple of 128 on the lane axis.
    tm = min(tm_max, M)
    tm = max(8, ((tm + 7) // 8) * 8)
    n_tiles = pl.cdiv(M, tm)
    M_pad = n_tiles * tm

    x2d = v.reshape(M, H).astype(jnp.float32)
    if M_pad != M:
        x2d = jnp.pad(x2d, ((0, M_pad - M), (0, 0)))

    w_f32 = w.astype(jnp.float32)
    b2d = b.reshape(1, E).astype(jnp.float32)

    matmul_flops = 2 * M_pad * H * E

    # ---------------- pass 1: per-channel sum / sumsq ----------------
    s, sq = pl.pallas_call(
        functools.partial(_stats_kernel, tm=tm, m_actual=M,
                          mask_tail=(M_pad != M)),
        out_shape=(jax.ShapeDtypeStruct((1, E), jnp.float32),
                   jax.ShapeDtypeStruct((1, E), jnp.float32)),
        grid=(n_tiles,),
        in_specs=[
            pl.BlockSpec((tm, H), lambda i: (i, 0)),   # x tile (pipelined)
            pl.BlockSpec((H, E), lambda i: (0, 0)),    # weight (resident)
            pl.BlockSpec((1, E), lambda i: (0, 0)),    # bias (resident)
        ],
        out_specs=(pl.BlockSpec((1, E), lambda i: (0, 0)),
                   pl.BlockSpec((1, E), lambda i: (0, 0))),
        compiler_params=pltpu.CompilerParams(
            # accumulator outputs are carried across the row axis
            dimension_semantics=("arbitrary",)),
        cost_estimate=pl.CostEstimate(
            flops=matmul_flops, transcendentals=0,
            bytes_accessed=4 * (M_pad * H + H * E + 2 * E)),
    )(x2d, w_f32, b2d)

    # Tiny per-channel epilogue constants (E-length vectors; plain JAX).
    mean = s / M
    var = jnp.maximum(sq / M - mean * mean, 0.0)       # biased var; guard cancellation
    inv_std = jax.lax.rsqrt(var + _BN_EPS)
    g2d = gamma.reshape(1, E).astype(jnp.float32)
    be2d = beta.reshape(1, E).astype(jnp.float32)
    scale = g2d * inv_std                              # (1, E)
    shift = be2d - mean * scale                        # (1, E)

    # ---------------- pass 2: recompute + scale/shift ----------------
    out2d = pl.pallas_call(
        _normalize_kernel,
        out_shape=jax.ShapeDtypeStruct((M_pad, E), v.dtype),
        grid=(n_tiles,),
        in_specs=[
            pl.BlockSpec((tm, H), lambda i: (i, 0)),   # x tile (pipelined)
            pl.BlockSpec((H, E), lambda i: (0, 0)),    # weight (resident)
            pl.BlockSpec((1, E), lambda i: (0, 0)),    # bias
            pl.BlockSpec((1, E), lambda i: (0, 0)),    # scale
            pl.BlockSpec((1, E), lambda i: (0, 0)),    # shift
        ],
        out_specs=pl.BlockSpec((tm, E), lambda i: (i, 0)),
        compiler_params=pltpu.CompilerParams(
            # row tiles independent -> megacore sharding on v7x
            dimension_semantics=("parallel",)),
        cost_estimate=pl.CostEstimate(
            flops=matmul_flops, transcendentals=0,
            bytes_accessed=4 * (M_pad * H + H * E + M_pad * E)),
    )(x2d, w_f32, b2d, scale, shift)

    if M_pad != M:
        out2d = out2d[:M]
    return out2d.reshape(B, L, E)


def reference_forward(v, w, b, gamma, beta):
    """Pure-JAX reference mirroring the PyTorch module (training-mode BN)."""
    h = jnp.einsum("blh,he->ble", v, w) + b          # Linear
    h = jnp.maximum(h, 0.0)                          # ReLU (applied pre-BN)
    mean = jnp.mean(h, axis=(0, 1), keepdims=True)   # per-channel batch stats
    var = jnp.mean((h - mean) ** 2, axis=(0, 1), keepdims=True)
    return gamma * (h - mean) / jnp.sqrt(var + 1e-5) + beta


if __name__ == "__main__":
    # Small shapes consistent with the module's forward: v is (B, L, hid_dim)
    B, L = 2, 8
    hid_dim, emb_dim = 32, 64

    key = jax.random.PRNGKey(0)
    k_v, k_w, k_b, k_v2 = jax.random.split(key, 4)

    v = jax.random.normal(k_v, (B, L, hid_dim), dtype=jnp.float32)

    # nn.Linear(hid_dim, emb_dim): weight (emb_dim, hid_dim), bias (emb_dim,)
    # Deterministic synthetic init (Kaiming-uniform-ish scale), stored transposed.
    bound = 1.0 / (hid_dim ** 0.5)
    w = jax.random.uniform(k_w, (hid_dim, emb_dim), jnp.float32, -bound, bound)
    b = jax.random.uniform(k_b, (emb_dim,), jnp.float32, -bound, bound)

    # nn.BatchNorm1d(emb_dim) affine params: PyTorch defaults
    gamma = jnp.ones((emb_dim,), jnp.float32)
    beta = jnp.zeros((emb_dim,), jnp.float32)

    out = protein_cnn_forward(v, w, b, gamma, beta)
    out = jax.block_until_ready(out)
    ref = reference_forward(v, w, b, gamma, beta)
    assert out.shape == (B, L, emb_dim)
    assert jnp.allclose(out, ref, atol=1e-4, rtol=1e-4), "mismatch vs reference"

    # Second check: exercise multi-tile grid + padded-tail masking
    # (M = 2*9 = 18 rows with tm_max=8 -> 3 tiles, 6 masked pad rows).
    v2 = jax.random.normal(k_v2, (2, 9, hid_dim), dtype=jnp.float32)
    out2 = protein_cnn_forward(v2, w, b, gamma, beta, tm_max=8)
    out2 = jax.block_until_ready(out2)
    ref2 = reference_forward(v2, w, b, gamma, beta)
    assert out2.shape == (2, 9, emb_dim)
    assert jnp.allclose(out2, ref2, atol=1e-4, rtol=1e-4), "tiled mismatch"

    print("KERNEL_OK")
</pallas_src>

<mosaic_0001>
module attributes {stable_mosaic.version = 11 : i64} {
  func.func @_stats_kernel(%arg0: i32, %arg1: memref<16x32xf32, #tpu.memory_space<vmem>>, %arg2: memref<32x64xf32, #tpu.memory_space<vmem>>, %arg3: memref<1x64xf32, #tpu.memory_space<vmem>>, %arg4: memref<1x64xf32, #tpu.memory_space<vmem>>, %arg5: memref<1x64xf32, #tpu.memory_space<vmem>>) attributes {dimension_semantics = [#tpu.dimension_semantics<arbitrary>], iteration_bounds = array<i64: 1>, scalar_prefetch = 0 : i64, scratch_operands = 0 : i64, tpu.core_type = #tpu.core_type<tc>, window_params = [{transform_indices = @transform_0, window_bounds = array<i64: 16, 32>}, {pipeline_mode = #tpu.pipeline_mode<synchronous>, transform_indices = @transform_1, window_bounds = array<i64: 32, 64>}, {pipeline_mode = #tpu.pipeline_mode<synchronous>, transform_indices = @transform_2, window_bounds = array<i64: 1, 64>}, {pipeline_mode = #tpu.pipeline_mode<synchronous>, transform_indices = @transform_3, window_bounds = array<i64: 1, 64>}, {pipeline_mode = #tpu.pipeline_mode<synchronous>, transform_indices = @transform_4, window_bounds = array<i64: 1, 64>}]} {
    %c0_i32 = arith.constant 0 : i32
    %0 = arith.cmpi eq, %arg0, %c0_i32 : i32
    %1 = arith.extui %0 : i1 to i32
    %c0_i32_0 = arith.constant 0 : i32
    %2 = arith.cmpi ne, %1, %c0_i32_0 : i32
    scf.if %2 {
      %cst_17 = arith.constant 0.000000e+00 : f32
      %22 = vector.broadcast %cst_17 : f32 to vector<1x64xf32>
      %c0_18 = arith.constant 0 : index
      %c0_19 = arith.constant 0 : index
      %23 = vector.load %arg4[%c0_18, %c0_19] : memref<1x64xf32, #tpu.memory_space<vmem>>, vector<1x64xf32>
      tpu.vector_store %arg4[%c0_18, %c0_19], %22 {strides = array<i32>} : memref<1x64xf32, #tpu.memory_space<vmem>>, vector<1x64xf32>,
      %cst_20 = arith.constant 0.000000e+00 : f32
      %24 = vector.broadcast %cst_20 : f32 to vector<1x64xf32>
      %c0_21 = arith.constant 0 : index
      %c0_22 = arith.constant 0 : index
      %25 = vector.load %arg5[%c0_21, %c0_22] : memref<1x64xf32, #tpu.memory_space<vmem>>, vector<1x64xf32>
      tpu.vector_store %arg5[%c0_21, %c0_22], %24 {strides = array<i32>} : memref<1x64xf32, #tpu.memory_space<vmem>>, vector<1x64xf32>,
    } else {
    }
    %c0 = arith.constant 0 : index
    %c0_1 = arith.constant 0 : index
    %3 = vector.load %arg1[%c0, %c0_1] : memref<16x32xf32, #tpu.memory_space<vmem>>, vector<16x32xf32>
    %c0_2 = arith.constant 0 : index
    %c0_3 = arith.constant 0 : index
    %4 = vector.load %arg2[%c0_2, %c0_3] : memref<32x64xf32, #tpu.memory_space<vmem>>, vector<32x64xf32>
    %cst = arith.constant dense<0.000000e+00> : vector<16x64xf32>
    %5 = tpu.matmul %3, %4, %cst {dimension_numbers = #tpu.dot_dimension_numbers<[1], [0], [0], [1], [0, 0, 1, 1], [], []>} : vector<16x32xf32>, vector<32x64xf32>, vector<16x64xf32> -> vector<16x64xf32>
    %c0_4 = arith.constant 0 : index
    %c0_5 = arith.constant 0 : index
    %6 = vector.load %arg3[%c0_4, %c0_5] : memref<1x64xf32, #tpu.memory_space<vmem>>, vector<1x64xf32>
    %7 = vector.broadcast %6 : vector<1x64xf32> to vector<16x64xf32>
    %8 = arith.addf %5, %7 : vector<16x64xf32>
    %cst_6 = arith.constant 0.000000e+00 : f32
    %9 = vector.broadcast %cst_6 : f32 to vector<16x64xf32>
    %10 = arith.maximumf %8, %9 : vector<16x64xf32>
    %c0_7 = arith.constant 0 : index
    %c0_8 = arith.constant 0 : index
    %11 = vector.load %arg4[%c0_7, %c0_8] : memref<1x64xf32, #tpu.memory_space<vmem>>, vector<1x64xf32>
    %cst_9 = arith.constant dense<0.000000e+00> : vector<64xf32>
    %12 = vector.multi_reduction <add>, %10, %cst_9 [0] : vector<16x64xf32> to vector<64xf32>
    %13 = vector.shape_cast %12 : vector<64xf32> to vector<1x64xf32>
    %14 = arith.addf %11, %13 : vector<1x64xf32>
    %c0_10 = arith.constant 0 : index
    %c0_11 = arith.constant 0 : index
    %15 = vector.load %arg4[%c0_10, %c0_11] : memref<1x64xf32, #tpu.memory_space<vmem>>, vector<1x64xf32>
    tpu.vector_store %arg4[%c0_10, %c0_11], %14 {strides = array<i32>} : memref<1x64xf32, #tpu.memory_space<vmem>>, vector<1x64xf32>,
    %c0_12 = arith.constant 0 : index
    %c0_13 = arith.constant 0 : index
    %16 = vector.load %arg5[%c0_12, %c0_13] : memref<1x64xf32, #tpu.memory_space<vmem>>, vector<1x64xf32>
    %17 = arith.mulf %10, %10 : vector<16x64xf32>
    %cst_14 = arith.constant dense<0.000000e+00> : vector<64xf32>
    %18 = vector.multi_reduction <add>, %17, %cst_14 [0] : vector<16x64xf32> to vector<64xf32>
    %19 = vector.shape_cast %18 : vector<64xf32> to vector<1x64xf32>
    %20 = arith.addf %16, %19 : vector<1x64xf32>
    %c0_15 = arith.constant 0 : index
    %c0_16 = arith.constant 0 : index
    %21 = vector.load %arg5[%c0_15, %c0_16] : memref<1x64xf32, #tpu.memory_space<vmem>>, vector<1x64xf32>
    tpu.vector_store %arg5[%c0_15, %c0_16], %20 {strides = array<i32>} : memref<1x64xf32, #tpu.memory_space<vmem>>, vector<1x64xf32>,
    return
  }
  func.func @transform_0(%arg0: i32) -> (i32, i32) {
    %c0_i32 = arith.constant 0 : i32
    %c0_i32_0 = arith.constant 0 : i32
    return %arg0, %c0_i32 : i32, i32
  }
  func.func @transform_1(%arg0: i32) -> (i32, i32) {
    %c0_i32 = arith.constant 0 : i32
    %c0_i32_0 = arith.constant 0 : i32
    %c0_i32_1 = arith.constant 0 : i32
    return %c0_i32, %c0_i32_0 : i32, i32
  }
  func.func @transform_2(%arg0: i32) -> (i32, i32) {
    %c0_i32 = arith.constant 0 : i32
    %c0_i32_0 = arith.constant 0 : i32
    %c0_i32_1 = arith.constant 0 : i32
    return %c0_i32, %c0_i32_0 : i32, i32
  }
  func.func @transform_3(%arg0: i32) -> (i32, i32) {
    %c0_i32 = arith.constant 0 : i32
    %c0_i32_0 = arith.constant 0 : i32
    %c0_i32_1 = arith.constant 0 : i32
    return %c0_i32, %c0_i32_0 : i32, i32
  }
  func.func @transform_4(%arg0: i32) -> (i32, i32) {
    %c0_i32 = arith.constant 0 : i32
    %c0_i32_0 = arith.constant 0 : i32
    %c0_i32_1 = arith.constant 0 : i32
    return %c0_i32, %c0_i32_0 : i32, i32
  }
}

</mosaic_0001>

<bundles_post_ra>
// kernel: tpu_custom_call.1
= control target key start
LH: loop header
LB: loop body
LE: loop exit
PB: predicated region body
PF: predicated region fallthrough
CT: control target
= control target key end

     0   :  { %10 = vsyncpa [#allocation3], 0  ;;  %s434_s0 = inlined_call_operand.hbm [shape: f32[16,32], index: 0, kind: input, shape index: {}]   ;;  %s435_s1 = inlined_call_operand.hbm [shape: f32[32,64], index: 1, kind: input, shape index: {}]   ;;  %s436_s2 = inlined_call_operand.vmem [shape: f32[1,64], index: 2, kind: input, shape index: {}]   ;;  %s437_s3 = inlined_call_operand.hbm [shape: f32[1,64], index: 3, kind: output, shape index: {0}]   ;;  %s438_s4 = inlined_call_operand.hbm [shape: f32[1,64], index: 4, kind: output, shape index: {1}]  }
   0x1   :  { %11 = vsyncpa [#allocation6], 0 }
   0x2   :  { %12 = vsyncpa [#allocation4], 0 }
   0x3   :  { %13 = vsyncpa [#allocation9], 0  ;;  %s339_s15 = smov [#allocation2]   ;;  %s243_s19 = scalar_lea.hbm %s434_s0, 256 }
   0x4   :  { %s19_s16 = sshll.u32 %s339_s15, 4  ;;  %p244_p0 = scmp.ne.s32.totalorder %s434_s0, %s243_s19  ;;  %s20_s16 = int_to_ptr.vmem [resolvable:$true] %s19_s16 }
   0x5   :  { %p247_p1 = scmp.lt.u32.totalorder %s243_s19, %s434_s0 }
   0x7   :  { %p249_p2 = pnand %p247_p1, %p244_p0 }
   0x9   :  { %252 = shalt.err (!%p249_p2)
}
   0xa   :  { %s253_s24 = scalar_lea.vmem %s20_s16, 256  ;;  %p258_p4 = scmp.lt.s32.totalorder %s20_s16, %s20_s16 }
   0xb   :  { %p254_p3 = scmp.ne.s32.totalorder %s20_s16, %s253_s24  ;;  %p259_p5 = scmp.lt.s32.totalorder %s253_s24, %s253_s24 }
   0xd   :  { %p260_p6 = por %p259_p5, %p258_p4 }
   0xf   :  { %p261_p7 = pnand %p260_p6, %p254_p3 }
  0x11   :  { %264 = shalt.err (!%p261_p7)
}
  0x12   :  { %s340_s25 = smov 128   ;;  %s341_s26 = smov 8  }
  0x13   :  { %25 = dma.hbm_to_vmem [thread:$0]  %s434_s0, 256, %s20_s16, [#allocation3], %s340_s25, %s340_s25, %s341_s26  }
  0x14   :  { %s342_s29 = smov [#allocation5]   ;;  %s265_s7 = scalar_lea.hbm %s435_s1, 512 }
  0x15   :  { %s31_s30 = sshll.u32 %s342_s29, 4  ;;  %p266_p8 = scmp.ne.s32.totalorder %s435_s1, %s265_s7  ;;  %s32_s30 = int_to_ptr.vmem [resolvable:$true] %s31_s30 }
  0x16   :  { %p269_p9 = scmp.lt.u32.totalorder %s265_s7, %s435_s1 }
  0x18   :  { %p271_p10 = pnand %p269_p9, %p266_p8 }
  0x1a   :  { %274 = shalt.err (!%p271_p10)
}
  0x1b   :  { %s275_s12 = scalar_lea.vmem %s32_s30, 512  ;;  %p280_p12 = scmp.lt.s32.totalorder %s32_s30, %s32_s30 }
  0x1c   :  { %p276_p11 = scmp.ne.s32.totalorder %s32_s30, %s275_s12  ;;  %p281_p13 = scmp.lt.s32.totalorder %s275_s12, %s275_s12 }
  0x1e   :  { %p282_p0 = por %p281_p13, %p280_p12 }
  0x20   :  { %p283_p1 = pnand %p282_p0, %p276_p11 }
  0x22   :  { %286 = shalt.err (!%p283_p1)
}
  0x23   :  { %37 = dma.hbm_to_vmem [thread:$0]  %s435_s1, 512, %s32_s30, [#allocation6], %s340_s25, %s340_s25, %s341_s26  }
  0x24   :  { %331 = dma.done.wait [#allocation3], 256  }
  0x25   :  { %332 = vsyncadd [#allocation3], 4294967040 }
  0x26   :  { %333 = dma.done.wait [#allocation6], 512  }
  0x27   :  { %334 = vsyncadd [#allocation6], 4294966784  ;;  %vm66_vm0 = vcmask 261120   ;;  %v55_v0 = vld [vmem:[#allocation5] sm:$0xff]  ;;  %v56_v1 = vld [vmem:[#allocation5 + $0x8] sm:$0xff]  ;;  %vm50_vm1 = vcmask 516096  }
  0x28   :  { %v57_v2 = vld [vmem:[#allocation5 + $0x10] sm:$0xff]  ;;  %v228_v3 = vpack.c.bf16 %v56_v1, %v55_v0  ;;  %v58_v4 = vld [vmem:[#allocation5 + $0x18] sm:$0xff]  ;;  %v343_v8 = vmov 0.0   ;;  %vm151_vm2 = vcmask 523264   ;;  %s345_s16 = smov [#allocation8]  }
  0x29   :  { %v53_v5 = vld [vmem:[#allocation2] sm:$0xff]  ;;  %v232_v6 = vpack.c.bf16 %v58_v4, %v57_v2  ;;  %v54_v7 = vld [vmem:[#allocation2 + $0x8] sm:$0xff]  ;;  %51 = vst.msk [vmem:[#allocation7] sm:$0x1] %vm50_vm1, %v343_v8  ;;  %52 = vst.msk [vmem:[#allocation8] sm:$0x1] %vm50_vm1, %v343_v8 }
  0x2a   :  { %225 = vmatprep.mubr.msk.f32.mxu0 %vm66_vm0, %v53_v5  ;;  %229 = vmatprep.subr.bf16.mxu0 %v228_v3  ;;  %v208_v9 = vld [vmem:[%s436_s2] ss:$0 sm:$0xff]  ;;  %s344_s2 = smov [#allocation7]   ;;  %s194_s17 = sshll.u32 %s345_s16, 4  ;;  %s401_s17 = int_to_ptr.vmem [resolvable:$true] %s194_s17 }
  0x2b   :  { %231 = vmatpush3.bf16.msra.mxu0 %v228_v3  ;;  %s184_s15 = sshll.u32 %s344_s2, 4  ;;  %s185_s15 = int_to_ptr.vmem [resolvable:$true] %s184_s15 }
  0x2c   :  { %233 = vmatprep.subr.bf16.mxu0 %v232_v6  ;;  %s287_s18 = scalar_lea.vmem %s185_s15, 16  ;;  %s291_s19 = scalar_lea.vmem %s185_s15, 32 }
  0x2d   :  { %p288_p2 = scmp.ne.s32.totalorder %s185_s15, %s287_s18  ;;  %p292_p3 = scmp.lt.s32.totalorder %s185_s15, %s185_s15 }
  0x2e   :  { %p293_p4 = scmp.lt.s32.totalorder %s291_s19, %s287_s18 }
  0x2f   :  { %235 = vmatpush3.bf16.msra.mxu0 %v232_v6 }
  0x30   :  { %v150_v33 = vld [vmem:[#allocation7] sm:$0x1]  ;;  %v164_v36 = vld [vmem:[#allocation8] sm:$0x1]  ;;  %p294_p5 = por %p293_p4, %p292_p3 }
  0x32   :  { %226 = vmatmul.mubr.msk.f32.vlgmr.msra.gmra.mrb[0].mxu0 %vm66_vm0, %v54_v7  ;;  %p295_p6 = pnand %p294_p5, %p288_p2 }
 0x105   :  { %v227_v10 = vpop.f32.mrb[0].mxu0 }
 0x106   :  { %v145_v11 = vadd.f32 %v227_v10, %v208_v9  ;;  %v139_v12 = vpop.f32.mrb[1].mxu0 }
 0x107   :  { %v140_v13 = vadd.f32 %v208_v9, %v139_v12 }
 0x108   :  { %v149_v14 = vmax.f32 %v145_v11, 0.0 }
 0x109   :  { %v148_v15 = vmax.f32 %v140_v13, 0.0 }
 0x10a   :  { %v153_v16 = vsel %vm151_vm2, %v149_v14, 0.0  ;;  %v166_v17 = vmul.f32 %v149_v14, %v149_v14 }
 0x10b   :  { %v152_v18 = vsel %vm151_vm2, %v148_v15, 0.0  ;;  %v165_v19 = vmul.f32 %v148_v15, %v148_v15 }
 0x10c   :  { %v168_v20 = vsel %vm151_vm2, %v166_v17, 0.0  ;;  %v154_v21 = vadd.f32 %v153_v16, %v152_v18 }
 0x10d   :  { %v167_v22 = vsel %vm151_vm2, %v165_v19, 0.0 }
 0x10e   :  { %v155_v23 = vrot.slane %v154_v21, 4  ;;  %v169_v24 = vadd.f32 %v168_v20, %v167_v22 }
 0x110   :  { %v156_v25 = vadd.f32 %v155_v23, %v154_v21  ;;  %v170_v26 = vrot.slane %v169_v24, 4 }
 0x112   :  { %v157_v27 = vrot.slane %v156_v25, 2  ;;  %v171_v28 = vadd.f32 %v170_v26, %v169_v24 }
 0x114   :  { %v158_v29 = vadd.f32 %v157_v27, %v156_v25  ;;  %v172_v30 = vrot.slane %v171_v28, 2 }
 0x116   :  { %v159_v31 = vrot.slane %v158_v29, 1  ;;  %v173_v32 = vadd.f32 %v172_v30, %v171_v28 }
 0x118   :  { %v160_v34 = vadd.f32 %v159_v31, %v158_v29  ;;  %v174_v35 = vrot.slane %v173_v32, 1 }
 0x11a   :  { %v161_v37 = vadd.f32 %v160_v34, %v150_v33  ;;  %v175_v38 = vadd.f32 %v174_v35, %v173_v32 }
 0x11c   :  { %163 = vst.msk [vmem:[#allocation7] sm:$0x1] %vm50_vm1, %v161_v37  ;;  %v176_v39 = vadd.f32 %v175_v38, %v164_v36 }
 0x11d   :  { %298 = shalt.err (!%p295_p6)
}
 0x11e   :  { %s299_s22 = scalar_lea.hbm %s437_s3, 16 }
 0x11f   :  { %p300_p7 = scmp.ne.s32.totalorder %s437_s3, %s299_s22  ;;  %p303_p8 = scmp.lt.u32.totalorder %s299_s22, %s437_s3 }
 0x121   :  { %p305_p9 = pnand %p303_p8, %p300_p7 }
 0x123   :  { %308 = shalt.err (!%p305_p9)
}
 0x124   :  { %187 = dma.vmem_to_hbm [thread:$0]  %s185_s15, 16, %s437_s3, [#allocation4]   ;;  %177 = vst.msk [vmem:[#allocation8] sm:$0x1] %vm50_vm1, %v176_v39 }
 0x125   :  { %s309_s29 = scalar_lea.vmem %s401_s17, 16  ;;  %s313_s30 = scalar_lea.vmem %s401_s17, 32 }
 0x126   :  { %p310_p10 = scmp.ne.s32.totalorder %s401_s17, %s309_s29  ;;  %p314_p11 = scmp.lt.s32.totalorder %s401_s17, %s401_s17 }
 0x127   :  { %p315_p12 = scmp.lt.s32.totalorder %s313_s30, %s309_s29 }
 0x129   :  { %p316_p13 = por %p315_p12, %p314_p11 }
 0x12b   :  { %p317_p0 = pnand %p316_p13, %p310_p10 }
 0x12d   :  { %320 = shalt.err (!%p317_p0)
}
 0x12e   :  { %s321_s7 = scalar_lea.hbm %s438_s4, 16 }
 0x12f   :  { %p322_p1 = scmp.ne.s32.totalorder %s438_s4, %s321_s7  ;;  %p325_p2 = scmp.lt.u32.totalorder %s321_s7, %s438_s4 }
 0x131   :  { %p327_p3 = pnand %p325_p2, %p322_p1 }
 0x133   :  { %330 = shalt.err (!%p327_p3)
}
 0x134   :  { %197 = dma.vmem_to_hbm [thread:$0]  %s401_s17, 16, %s438_s4, [#allocation9]  }
 0x135   :  { %335 = dma.done.wait [#allocation4], 16  }
 0x136   :  { %336 = vsyncadd [#allocation4], 4294967280 }
 0x137   :  { %337 = dma.done.wait [#allocation9], 16  }
 0x138   :  { %338 = vsyncadd [#allocation9], 4294967280 }
 0x139   :  { %204 = vsyncpa [#allocation3], 1 }
 0x13a   :  { %205 = vsyncpa [#allocation6], 1 }
 0x13b   :  { %206 = vsyncpa [#allocation4], 1 }
 0x13c   :  { %207 = vsyncpa [#allocation9], 1 }

</bundles_post_ra>
